<compile_context>
chip_gen: v6e
topology: v6e:2x2x1
jax: 0.10.0
libtpu: 0.0.40
codegen_flags: <defaults>
</compile_context>

<pallas_src>
import functools

import jax
import jax.numpy as jnp
from jax.experimental import pallas as pl
from jax.experimental.pallas import tpu as pltpu


def _grn_kernel(x_ref, gamma_ref, beta_ref, o_ref, *, eps):
    # x_ref block: (1, H*W, C); gamma/beta blocks: (1, C); o_ref: (1, H*W, C)
    x = x_ref[0].astype(jnp.float32)                      # (HW, C)

    # Gx = ||x||_2 over spatial dims, per channel.
    sumsq = jnp.sum(x * x, axis=0, keepdims=True)         # (1, C)  sublane reduce
    gx = jnp.sqrt(sumsq)                                  # (1, C)

    # Nx = Gx / (mean_C(Gx) + eps)
    mean_gx = jnp.mean(gx, axis=-1, keepdims=True)        # (1, 1)  lane reduce
    nx = gx / (mean_gx + eps)                             # (1, C)

    # out = (gamma * Nx + 1) * x + beta
    scale = gamma_ref[...].astype(jnp.float32) * nx + 1.0  # (1, C)
    out = scale * x + beta_ref[...].astype(jnp.float32)    # (HW, C) broadcast

    o_ref[0] = out.astype(o_ref.dtype)


def grn_nhwc(x, gamma, beta=None, eps=1e-6):
    """GRNwithNHWC forward.  x: (N, H, W, C), gamma/beta: (C,)."""
    N, H, W, C = x.shape
    if beta is None:                      # use_bias=False path
        beta = jnp.zeros((C,), jnp.float32)

    x3 = x.reshape(N, H * W, C)           # free reshape: lane dim stays C
    gamma2 = gamma.reshape(1, C).astype(jnp.float32)
    beta2 = beta.reshape(1, C).astype(jnp.float32)

    # VMEM budget: in + out slabs, double-buffered, plus params/headroom.
    slab_bytes = H * W * C * jnp.dtype(x.dtype).itemsize
    vmem_limit = int(min(max(4 * slab_bytes + (2 << 20), 32 << 20), 48 << 20))
    # TODO(synk): for slabs too large for VMEM (very high-res inputs), switch to
    # a two-pass spatially-tiled reduction+apply structure.

    out = pl.pallas_call(
        functools.partial(_grn_kernel, eps=eps),
        out_shape=jax.ShapeDtypeStruct((N, H * W, C), x.dtype),
        grid=(N,),
        in_specs=[
            pl.BlockSpec((1, H * W, C), lambda n: (n, 0, 0)),
            pl.BlockSpec((1, C), lambda n: (0, 0)),
            pl.BlockSpec((1, C), lambda n: (0, 0)),
        ],
        out_specs=pl.BlockSpec((1, H * W, C), lambda n: (n, 0, 0)),
        compiler_params=pltpu.CompilerParams(
            dimension_semantics=("parallel",),
            vmem_limit_bytes=vmem_limit,
        ),
    )(x3, gamma2, beta2)

    return out.reshape(N, H, W, C)


if __name__ == "__main__":
    key = jax.random.PRNGKey(0)
    k1, k2, k3 = jax.random.split(key, 3)

    N, H, W, C = 2, 16, 16, 4
    x = jax.random.normal(k1, (N, H, W, C), dtype=jnp.float32)
    gamma = 0.1 * jax.random.normal(k2, (C,), dtype=jnp.float32)
    beta = 0.1 * jax.random.normal(k3, (C,), dtype=jnp.float32)

    out = grn_nhwc(x, gamma, beta)
    out = jax.block_until_ready(out)

    # Pure-JAX reference of the PyTorch forward.
    gx = jnp.sqrt(jnp.sum(x * x, axis=(1, 2), keepdims=True))          # (N,1,1,C)
    nx = gx / (jnp.mean(gx, axis=-1, keepdims=True) + 1e-6)            # (N,1,1,C)
    ref = (gamma.reshape(1, 1, 1, C) * nx + 1.0) * x + beta.reshape(1, 1, 1, C)

    assert out.shape == x.shape, out.shape
    assert out.dtype == x.dtype, out.dtype
    assert jnp.allclose(out, ref, rtol=1e-5, atol=1e-5), "mismatch vs reference GRN"
    print("KERNEL_OK")
</pallas_src>

<mosaic_0001>
module attributes {stable_mosaic.version = 11 : i64} {
  func.func @_grn_kernel(%arg0: i32, %arg1: memref<1x256x4xf32, #tpu.memory_space<vmem>>, %arg2: memref<1x4xf32, #tpu.memory_space<vmem>>, %arg3: memref<1x4xf32, #tpu.memory_space<vmem>>, %arg4: memref<1x256x4xf32, #tpu.memory_space<vmem>>) attributes {dimension_semantics = [#tpu.dimension_semantics<parallel>], iteration_bounds = array<i64: 2>, scalar_prefetch = 0 : i64, scratch_operands = 0 : i64, tpu.core_type = #tpu.core_type<tc>, window_params = [{transform_indices = @transform_0, window_bounds = array<i64: 1, 256, 4>}, {pipeline_mode = #tpu.pipeline_mode<synchronous>, transform_indices = @transform_1, window_bounds = array<i64: 1, 4>}, {pipeline_mode = #tpu.pipeline_mode<synchronous>, transform_indices = @transform_2, window_bounds = array<i64: 1, 4>}, {transform_indices = @transform_3, window_bounds = array<i64: 1, 256, 4>}]} {
    %c0 = arith.constant 0 : index
    %c0_0 = arith.constant 0 : index
    %c0_1 = arith.constant 0 : index
    %0 = vector.load %arg1[%c0, %c0_0, %c0_1] : memref<1x256x4xf32, #tpu.memory_space<vmem>>, vector<1x256x4xf32>
    %1 = vector.shape_cast %0 : vector<1x256x4xf32> to vector<256x4xf32>
    %2 = arith.mulf %1, %1 : vector<256x4xf32>
    %cst = arith.constant dense<0.000000e+00> : vector<4xf32>
    %3 = vector.multi_reduction <add>, %2, %cst [0] : vector<256x4xf32> to vector<4xf32>
    %4 = vector.shape_cast %3 : vector<4xf32> to vector<1x4xf32>
    %5 = math.sqrt %4 : vector<1x4xf32>
    %cst_2 = arith.constant dense<0.000000e+00> : vector<1xf32>
    %6 = vector.multi_reduction <add>, %5, %cst_2 [1] : vector<1x4xf32> to vector<1xf32>
    %7 = vector.shape_cast %6 : vector<1xf32> to vector<1x1xf32>
    %cst_3 = arith.constant 4.000000e+00 : f32
    %8 = vector.broadcast %cst_3 : f32 to vector<1x1xf32>
    %9 = arith.divf %7, %8 : vector<1x1xf32>
    %cst_4 = arith.constant 9.99999997E-7 : f32
    %10 = vector.broadcast %cst_4 : f32 to vector<1x1xf32>
    %11 = arith.addf %9, %10 : vector<1x1xf32>
    %12 = vector.broadcast %11 : vector<1x1xf32> to vector<1x4xf32>
    %13 = arith.divf %5, %12 : vector<1x4xf32>
    %c0_5 = arith.constant 0 : index
    %c0_6 = arith.constant 0 : index
    %14 = vector.load %arg2[%c0_5, %c0_6] : memref<1x4xf32, #tpu.memory_space<vmem>>, vector<1x4xf32>
    %15 = arith.mulf %14, %13 : vector<1x4xf32>
    %cst_7 = arith.constant 1.000000e+00 : f32
    %16 = vector.broadcast %cst_7 : f32 to vector<1x4xf32>
    %17 = arith.addf %15, %16 : vector<1x4xf32>
    %18 = vector.broadcast %17 : vector<1x4xf32> to vector<256x4xf32>
    %19 = arith.mulf %18, %1 : vector<256x4xf32>
    %c0_8 = arith.constant 0 : index
    %c0_9 = arith.constant 0 : index
    %20 = vector.load %arg3[%c0_8, %c0_9] : memref<1x4xf32, #tpu.memory_space<vmem>>, vector<1x4xf32>
    %21 = vector.broadcast %20 : vector<1x4xf32> to vector<256x4xf32>
    %22 = arith.addf %19, %21 : vector<256x4xf32>
    %c0_10 = arith.constant 0 : index
    %c0_11 = arith.constant 0 : index
    %c0_12 = arith.constant 0 : index
    %23 = vector.load %arg4[%c0_10, %c0_11, %c0_12] : memref<1x256x4xf32, #tpu.memory_space<vmem>>, vector<1x256x4xf32>
    %24 = vector.shape_cast %23 : vector<1x256x4xf32> to vector<256x4xf32>
    %25 = vector.shape_cast %22 : vector<256x4xf32> to vector<1x256x4xf32>
    tpu.vector_store %arg4[%c0_10, %c0_11, %c0_12], %25 {strides = array<i32>} : memref<1x256x4xf32, #tpu.memory_space<vmem>>, vector<1x256x4xf32>,
    return
  }
  func.func @transform_0(%arg0: i32) -> (i32, i32, i32) {
    %c0_i32 = arith.constant 0 : i32
    %c0_i32_0 = arith.constant 0 : i32
    %c0_i32_1 = arith.constant 0 : i32
    return %arg0, %c0_i32, %c0_i32_0 : i32, i32, i32
  }
  func.func @transform_1(%arg0: i32) -> (i32, i32) {
    %c0_i32 = arith.constant 0 : i32
    %c0_i32_0 = arith.constant 0 : i32
    %c0_i32_1 = arith.constant 0 : i32
    return %c0_i32, %c0_i32_0 : i32, i32
  }
  func.func @transform_2(%arg0: i32) -> (i32, i32) {
    %c0_i32 = arith.constant 0 : i32
    %c0_i32_0 = arith.constant 0 : i32
    %c0_i32_1 = arith.constant 0 : i32
    return %c0_i32, %c0_i32_0 : i32, i32
  }
  func.func @transform_3(%arg0: i32) -> (i32, i32, i32) {
    %c0_i32 = arith.constant 0 : i32
    %c0_i32_0 = arith.constant 0 : i32
    %c0_i32_1 = arith.constant 0 : i32
    return %arg0, %c0_i32, %c0_i32_0 : i32, i32, i32
  }
}

</mosaic_0001>

<bundles_post_ra>
// kernel: tpu_custom_call.1
= control target key start
LH: loop header
LB: loop body
LE: loop exit
PB: predicated region body
PF: predicated region fallthrough
CT: control target
= control target key end

     0   :  { %s541_s12 = smov 0   ;;  %s864_s0 = inlined_call_operand.vmem [shape: f32[2,256,4], index: 0, kind: input, shape index: {}]   ;;  %s865_s1 = inlined_call_operand.vmem [shape: f32[1,4], index: 1, kind: input, shape index: {}]   ;;  %s866_s2 = inlined_call_operand.vmem [shape: f32[1,4], index: 2, kind: input, shape index: {}]   ;;  %s867_s3 = inlined_call_operand.vmem [shape: f32[2,256,4], index: 3, kind: output, shape index: {}]  }
   0x1 LB: > { %s487_s13 = sadd.s32 4294967295, %s519_s12   ;;  %p491_p0 = scmp.ge.s32.totalorder %s519_s12, 1  ;;  %s519_s12 = sphi %s541_s12, %s13_s12  }
   0x2   : > { %p137_p1 = scmp.lt.s32.totalorder %s519_s12, 3 }
   0x4   : > { %p138_p2 = pnand %p491_p0, %p137_p1 }
   0x5   : > { %p161_p3 = scmp.lt.s32.totalorder (!%p138_p2), %s487_s13, 1 }
   0x6   : > { %141 = sbr.rel (%p138_p2) target bundleno = 302 (0x12e), region = 32 }
   0xb   : > { %s869_s13 = smov (!%p161_p3, %s487_s13), 1  ;;  %vm235_vm0 = vcmask 31744  }
   0xc   : > { %s499_s14 = sshll.u32 %s869_s13, 8 }
   0xd   : > { %s557_s17 = scalar_lea.vmem %s864_s0, %s499_s14  ;;  %s791_s24 = scalar_lea.vmem %s867_s3, %s499_s14 }
   0xe   : > { %v560_v0 = vld [vmem:[%s557_s17] sm:$0xff]  ;;  %v563_v1 = vld [vmem:[%s557_s17 + $0x8] sm:$0xff]  ;;  %v566_v2 = vld [vmem:[%s557_s17 + $0x10] sm:$0xff] }
   0xf   : > { %v569_v3 = vld [vmem:[%s557_s17 + $0x18] sm:$0xff]  ;;  %v203_v4 = vmul.f32 %v560_v0, %v560_v0  ;;  %v204_v5 = vmul.f32 %v563_v1, %v563_v1  ;;  %v205_v6 = vmul.f32 %v566_v2, %v566_v2  ;;  %v578_v7 = vld [vmem:[%s557_s17 + $0x20] sm:$0xff]  ;;  %v582_v9 = vld [vmem:[%s557_s17 + $0x28] sm:$0xff] }
  0x10   : > { %v206_v10 = vmul.f32 %v569_v3, %v569_v3  ;;  %v588_v12 = vld [vmem:[%s557_s17 + $0x30] sm:$0xff]  ;;  %v207_v14 = vmul.f32 %v578_v7, %v578_v7  ;;  %v594_v16 = vld [vmem:[%s557_s17 + $0x38] sm:$0xff]  ;;  %v208_v17 = vmul.f32 %v582_v9, %v582_v9  ;;  %v602_v21 = vld [vmem:[%s557_s17 + $0x40] sm:$0xff] }
  0x11   : > { %v236_v8 = vsel %vm235_vm0, %v203_v4, 0.0  ;;  %v237_v11 = vsel %vm235_vm0, %v204_v5, 0.0  ;;  %v239_v15 = vsel %vm235_vm0, %v205_v6, 0.0  ;;  %v209_v19 = vmul.f32 %v588_v12, %v588_v12  ;;  %v608_v25 = vld [vmem:[%s557_s17 + $0x48] sm:$0xff]  ;;  %v615_v30 = vld [vmem:[%s557_s17 + $0x50] sm:$0xff]  ;;  %v621_v34 = vld [vmem:[%s557_s17 + $0x58] sm:$0xff] }
  0x12   : > { %v238_v13 = vadd.f32 %v237_v11, %v236_v8  ;;  %v241_v20 = vsel %vm235_vm0, %v206_v10, 0.0  ;;  %v210_v23 = vmul.f32 %v594_v16, %v594_v16  ;;  %v243_v24 = vsel %vm235_vm0, %v207_v14, 0.0  ;;  %v627_v38 = vld [vmem:[%s557_s17 + $0x60] sm:$0xff]  ;;  %v633_v42 = vld [vmem:[%s557_s17 + $0x68] sm:$0xff]  ;;  %v639_v46 = vld [vmem:[%s557_s17 + $0x70] sm:$0xff] }
  0x13   : > { %v245_v27 = vsel %vm235_vm0, %v208_v17, 0.0  ;;  %v211_v28 = vmul.f32 %v602_v21, %v602_v21  ;;  %v247_v29 = vsel %vm235_vm0, %v209_v19, 0.0  ;;  %v212_v32 = vmul.f32 %v608_v25, %v608_v25  ;;  %v645_v50 = vld [vmem:[%s557_s17 + $0x78] sm:$0xff]  ;;  %v651_v54 = vld [vmem:[%s557_s17 + $0x80] sm:$0xff]  ;;  %v657_v58 = vld [vmem:[%s557_s17 + $0x88] sm:$0xff] }
  0x14   : > { %v240_v18 = vadd.f32 %v239_v15, %v238_v13  ;;  %v249_v33 = vsel %vm235_vm0, %v210_v23, 0.0  ;;  %v213_v36 = vmul.f32 %v615_v30, %v615_v30  ;;  %v214_v40 = vmul.f32 %v621_v34, %v621_v34  ;;  %v663_v62 = vld [vmem:[%s557_s17 + $0x90] sm:$0xff]  ;;  %v669_v6 = vld [vmem:[%s557_s17 + $0x98] sm:$0xff]  ;;  %v675_v13 = vld [vmem:[%s557_s17 + $0xa0] sm:$0xff] }
  0x15   : > { %v251_v37 = vsel %vm235_vm0, %v211_v28, 0.0  ;;  %v253_v41 = vsel %vm235_vm0, %v212_v32, 0.0  ;;  %v215_v44 = vmul.f32 %v627_v38, %v627_v38  ;;  %v216_v48 = vmul.f32 %v633_v42, %v633_v42  ;;  %v687_v23 = vld [vmem:[%s557_s17 + $0xb0] sm:$0xff]  ;;  %v693_v28 = vld [vmem:[%s557_s17 + $0xb8] sm:$0xff] }
  0x16   : > { %v242_v22 = vadd.f32 %v241_v20, %v240_v18  ;;  %v255_v45 = vsel %vm235_vm0, %v213_v36, 0.0  ;;  %v257_v49 = vsel %vm235_vm0, %v214_v40, 0.0  ;;  %v217_v52 = vmul.f32 %v639_v46, %v639_v46  ;;  %v681_v18 = vld [vmem:[%s557_s17 + $0xa8] sm:$0xff] }
  0x17   : > { %v259_v53 = vsel %vm235_vm0, %v215_v44, 0.0  ;;  %v218_v56 = vmul.f32 %v645_v50, %v645_v50  ;;  %v261_v57 = vsel %vm235_vm0, %v216_v48, 0.0  ;;  %v219_v60 = vmul.f32 %v651_v54, %v651_v54  ;;  %v711_v44 = vld [vmem:[%s557_s17 + $0xd0] sm:$0xff] }
  0x18   : > { %v244_v26 = vadd.f32 %v243_v24, %v242_v22  ;;  %v263_v61 = vsel %vm235_vm0, %v217_v52, 0.0  ;;  %v220_v4 = vmul.f32 %v657_v58, %v657_v58  ;;  %v221_v10 = vmul.f32 %v663_v62, %v663_v62 }
  0x19   : > { %v265_v5 = vsel %vm235_vm0, %v218_v56, 0.0  ;;  %v267_v11 = vsel %vm235_vm0, %v219_v60, 0.0  ;;  %v222_v15 = vmul.f32 %v669_v6, %v669_v6  ;;  %v223_v20 = vmul.f32 %v675_v13, %v675_v13  ;;  %v729_v60 = vld [vmem:[%s557_s17 + $0xe8] sm:$0xff] }
  0x1a   : > { %v246_v31 = vadd.f32 %v245_v27, %v244_v26  ;;  %v269_v17 = vsel %vm235_vm0, %v220_v4, 0.0  ;;  %v271_v22 = vsel %vm235_vm0, %v221_v10, 0.0  ;;  %v224_v26 = vmul.f32 %v681_v18, %v681_v18 }
  0x1b   : > { %v273_v27 = vsel %vm235_vm0, %v222_v15, 0.0  ;;  %v275_v32 = vsel %vm235_vm0, %v223_v20, 0.0  ;;  %v226_v36 = vmul.f32 %v693_v28, %v693_v28  ;;  %v229_v52 = vmul.f32 %v711_v44, %v711_v44 }
  0x1c   : > { %v248_v35 = vadd.f32 %v247_v29, %v246_v31  ;;  %v225_v31 = vmul.f32 %v687_v23, %v687_v23  ;;  %v232_v10 = vmul.f32 %v729_v60, %v729_v60 }
  0x1d   : > { %v281_v48 = vsel %vm235_vm0, %v226_v36, 0.0  ;;  %v287_v4 = vsel %vm235_vm0, %v229_v52, 0.0 }
  0x1e   : > { %v250_v39 = vadd.f32 %v249_v33, %v248_v35  ;;  %v699_v33 = vld [vmem:[%s557_s17 + $0xc0] sm:$0xff] }
  0x20   : > { %v252_v43 = vadd.f32 %v251_v37, %v250_v39  ;;  %v277_v37 = vsel %vm235_vm0, %v224_v26, 0.0  ;;  %v705_v39 = vld [vmem:[%s557_s17 + $0xc8] sm:$0xff] }
  0x22   : > { %v254_v47 = vadd.f32 %v253_v41, %v252_v43  ;;  %v227_v41 = vmul.f32 %v699_v33, %v699_v33  ;;  %v279_v43 = vsel %vm235_vm0, %v225_v31, 0.0 }
  0x24   : > { %v256_v51 = vadd.f32 %v255_v45, %v254_v47  ;;  %v228_v47 = vmul.f32 %v705_v39, %v705_v39 }
  0x26   : > { %v258_v55 = vadd.f32 %v257_v49, %v256_v51  ;;  %v717_v49 = vld [vmem:[%s557_s17 + $0xd8] sm:$0xff] }
  0x28   : > { %v260_v59 = vadd.f32 %v259_v53, %v258_v55  ;;  %v283_v53 = vsel %vm235_vm0, %v227_v41, 0.0  ;;  %v723_v55 = vld [vmem:[%s557_s17 + $0xe0] sm:$0xff] }
  0x2a   : > { %v262_v63 = vadd.f32 %v261_v57, %v260_v59  ;;  %v230_v57 = vmul.f32 %v717_v49, %v717_v49  ;;  %v285_v59 = vsel %vm235_vm0, %v228_v47, 0.0 }
  0x2c   : > { %v264_v8 = vadd.f32 %v263_v61, %v262_v63  ;;  %v231_v63 = vmul.f32 %v723_v55, %v723_v55 }
  0x2e   : > { %v266_v14 = vadd.f32 %v265_v5, %v264_v8  ;;  %v735_v5 = vld [vmem:[%s557_s17 + $0xf0] sm:$0xff] }
  0x30   : > { %v268_v19 = vadd.f32 %v267_v11, %v266_v14  ;;  %v289_v11 = vsel %vm235_vm0, %v230_v57, 0.0  ;;  %v741_v14 = vld [vmem:[%s557_s17 + $0xf8] sm:$0xff] }
  0x32   : > { %v270_v24 = vadd.f32 %v269_v17, %v268_v19  ;;  %v233_v17 = vmul.f32 %v735_v5, %v735_v5  ;;  %v291_v19 = vsel %vm235_vm0, %v231_v63, 0.0  ;;  %v324_v63 = vlaneseq }
  0x34   : > { %v272_v29 = vadd.f32 %v271_v22, %v270_v24  ;;  %v234_v22 = vmul.f32 %v741_v14, %v741_v14  ;;  %v293_v24 = vsel %vm235_vm0, %v232_v10, 0.0  ;;  %v320_v10 = vld [vmem:[%s865_s1] sm:$0x1] }
  0x36   : > { %v274_v35 = vadd.f32 %v273_v27, %v272_v29  ;;  %v295_v27 = vsel %vm235_vm0, %v233_v17, 0.0  ;;  %v297_v31 = vsel %vm235_vm0, %v234_v22, 0.0 }
  0x38   : > { %v276_v40 = vadd.f32 %v275_v32, %v274_v35 }
  0x3a   : > { %v278_v45 = vadd.f32 %v277_v37, %v276_v40 }
  0x3c   : > { %v280_v51 = vadd.f32 %v279_v43, %v278_v45 }
  0x3e   : > { %v282_v56 = vadd.f32 %v281_v48, %v280_v51 }
  0x40   : > { %v284_v61 = vadd.f32 %v283_v53, %v282_v56 }
  0x42   : > { %v286_v8 = vadd.f32 %v285_v59, %v284_v61 }
  0x44   : > { %v288_v15 = vadd.f32 %v287_v4, %v286_v8  ;;  %v325_v4 = vshrl.u32 %v324_v63, 7 }
  0x46   : > { %v290_v20 = vadd.f32 %v289_v11, %v288_v15  ;;  %v326_v17 = vsub.s32 0, %v325_v4 }
  0x48   : > { %v292_v26 = vadd.f32 %v291_v19, %v290_v20 }
  0x4a   : > { %v294_v29 = vadd.f32 %v293_v24, %v292_v26 }
  0x4c   : > { %v296_v32 = vadd.f32 %v295_v27, %v294_v29 }
  0x4e   : > { %v298_v35 = vadd.f32 %v297_v31, %v296_v32 }
  0x50   : > { %v299_v36 = vrot.slane %v298_v35, 4 }
  0x52   : > { %v300_v37 = vadd.f32 %v299_v36, %v298_v35 }
  0x54   : > { %v301_v40 = vrot.slane %v300_v37, 2 }
  0x56   : > { %v302_v41 = vadd.f32 %v301_v40, %v300_v37 }
  0x58   : > { %v303_v43 = vrot.slane %v302_v41, 1 }
  0x5a   : > { %v304_v45 = vadd.f32 %v303_v43, %v302_v41 }
  0x5c   : > { %509 = vrsqrt.f32 %v304_v45  ;;  %vm307_vm1 = vcmp.eq.f32.partialorder %v304_v45, inf  ;;  %v310_v48 = vand.u32 2147483648, %v304_v45  ;;  %vm309_vm2 = vcmp.eq.f32.partialorder %v304_v45, 0.0 }
  0x69   : > { %v510_v47 = vpop.eup %509 }
  0x6a   : > { %v306_v51 = vmul.f32 %v510_v47, %v304_v45 }
  0x6c   : > { %v308_v52 = vsel %vm307_vm1, %v304_v45, %v306_v51 }
  0x6d   : > { %v311_v53 = vsel %vm309_vm2, %v310_v48, %v308_v52 }
  0x6e   : > { %v312_v56 = vsel %vm235_vm0, %v311_v53, 0.0 }
  0x6f   : > { %313 = vadd.xlane.f32.xlu0 %v312_v56 }
  0xf8   : > { %v314_v57 = vpop.xlane.xlu0 %313 }
  0xf9   : > { %v316_v59 = vmul.f32 0.25, %v314_v57 }
  0xfb   : > { %v317_v61 = vadd.f32 1e-06, %v316_v59 }
  0xfd   : > { %511 = vrcp.f32 %v317_v61 }
 0x10a   : > { %v512_v8 = vpop.eup %511 }
 0x10b   : > { %v319_v11 = vmul.f32 %v512_v8, %v311_v53 }
 0x10d   : > { %v321_v15 = vmul.f32 %v320_v10, %v319_v11 }
 0x10f   : > { %v322_v19 = vadd.f32 1.0, %v321_v15 }
 0x111   : > { %v327_v20 = vrot.slane %v322_v19, %v326_v17 }
 0x113   : > { %v329_v22 = vmul.f32 %v327_v20, %v560_v0  ;;  %v330_v24 = vmul.f32 %v327_v20, %v563_v1  ;;  %v331_v26 = vmul.f32 %v327_v20, %v566_v2  ;;  %v332_v27 = vmul.f32 %v327_v20, %v569_v3 }
 0x114   : > { %v333_v29 = vmul.f32 %v327_v20, %v578_v7  ;;  %v334_v31 = vmul.f32 %v327_v20, %v582_v9  ;;  %v335_v32 = vmul.f32 %v327_v20, %v588_v12  ;;  %v336_v35 = vmul.f32 %v327_v20, %v594_v16 }
 0x115   : > { %v337_v36 = vmul.f32 %v327_v20, %v602_v21  ;;  %v338_v37 = vmul.f32 %v327_v20, %v608_v25  ;;  %v339_v0 = vmul.f32 %v327_v20, %v615_v30  ;;  %v340_v1 = vmul.f32 %v327_v20, %v621_v34 }
 0x116   : > { %v341_v2 = vmul.f32 %v327_v20, %v627_v38  ;;  %v342_v3 = vmul.f32 %v327_v20, %v633_v42  ;;  %v343_v7 = vmul.f32 %v327_v20, %v639_v46  ;;  %v344_v9 = vmul.f32 %v327_v20, %v645_v50  ;;  %v496_v46 = vld [vmem:[%s866_s2] ss:$0 sm:$0xff] }
 0x117   : > { %v345_v12 = vmul.f32 %v327_v20, %v651_v54  ;;  %v346_v16 = vmul.f32 %v327_v20, %v657_v58  ;;  %v347_v21 = vmul.f32 %v327_v20, %v663_v62  ;;  %v348_v25 = vmul.f32 %v327_v20, %v669_v6 }
 0x118   : > { %v349_v30 = vmul.f32 %v327_v20, %v675_v13  ;;  %v350_v34 = vmul.f32 %v327_v20, %v681_v18  ;;  %v351_v38 = vmul.f32 %v327_v20, %v687_v23  ;;  %v352_v42 = vmul.f32 %v327_v20, %v693_v28 }
 0x119   : > { %v353_v50 = vmul.f32 %v327_v20, %v699_v33  ;;  %v354_v54 = vmul.f32 %v327_v20, %v705_v39  ;;  %v355_v58 = vmul.f32 %v327_v20, %v711_v44  ;;  %v356_v62 = vmul.f32 %v327_v20, %v717_v49 }
 0x11a   : > { %v357_v6 = vmul.f32 %v327_v20, %v723_v55  ;;  %v358_v13 = vmul.f32 %v327_v20, %v729_v60  ;;  %v359_v18 = vmul.f32 %v327_v20, %v735_v5  ;;  %v360_v23 = vmul.f32 %v327_v20, %v741_v14 }
 0x11b   : > { %v368_v28 = vadd.f32 %v496_v46, %v329_v22  ;;  %v369_v33 = vadd.f32 %v496_v46, %v330_v24  ;;  %v370_v39 = vadd.f32 %v496_v46, %v331_v26  ;;  %v371_v44 = vadd.f32 %v496_v46, %v332_v27 }
 0x11c   : > { %v372_v49 = vadd.f32 %v496_v46, %v333_v29  ;;  %v373_v40 = vadd.f32 %v496_v46, %v334_v31  ;;  %v374_v41 = vadd.f32 %v496_v46, %v335_v32  ;;  %v375_v55 = vadd.f32 %v496_v46, %v336_v35 }
 0x11d   : > { %v376_v60 = vadd.f32 %v496_v46, %v337_v36  ;;  %v377_v43 = vadd.f32 %v496_v46, %v338_v37  ;;  %v378_v45 = vadd.f32 %v496_v46, %v339_v0  ;;  %v379_v5 = vadd.f32 %v496_v46, %v340_v1  ;;  %400 = vst.msk [vmem:[%s791_s24] sm:$0xff] %vm235_vm0, %v368_v28 }
 0x11e   : > { %401 = vst.msk [vmem:[%s791_s24 + $0x8] sm:$0xff] %vm235_vm0, %v369_v33  ;;  %402 = vst.msk [vmem:[%s791_s24 + $0x10] sm:$0xff] %vm235_vm0, %v370_v39  ;;  %v380_v14 = vadd.f32 %v496_v46, %v341_v2  ;;  %v381_v47 = vadd.f32 %v496_v46, %v342_v3  ;;  %v382_v48 = vadd.f32 %v496_v46, %v343_v7 }
 0x11f   : > { %403 = vst.msk [vmem:[%s791_s24 + $0x18] sm:$0xff] %vm235_vm0, %v371_v44  ;;  %v383_v51 = vadd.f32 %v496_v46, %v344_v9  ;;  %404 = vst.msk [vmem:[%s791_s24 + $0x20] sm:$0xff] %vm235_vm0, %v372_v49  ;;  %v384_v52 = vadd.f32 %v496_v46, %v345_v12  ;;  %v385_v53 = vadd.f32 %v496_v46, %v346_v16 }
 0x120   : > { %405 = vst.msk [vmem:[%s791_s24 + $0x28] sm:$0xff] %vm235_vm0, %v373_v40  ;;  %406 = vst.msk [vmem:[%s791_s24 + $0x30] sm:$0xff] %vm235_vm0, %v374_v41  ;;  %v386_v56 = vadd.f32 %v496_v46, %v347_v21  ;;  %v387_v57 = vadd.f32 %v496_v46, %v348_v25  ;;  %v388_v59 = vadd.f32 %v496_v46, %v349_v30 }
 0x121   : > { %407 = vst.msk [vmem:[%s791_s24 + $0x38] sm:$0xff] %vm235_vm0, %v375_v55  ;;  %408 = vst.msk [vmem:[%s791_s24 + $0x40] sm:$0xff] %vm235_vm0, %v376_v60  ;;  %v389_v61 = vadd.f32 %v496_v46, %v350_v34  ;;  %v390_v63 = vadd.f32 %v496_v46, %v351_v38  ;;  %v391_v4 = vadd.f32 %v496_v46, %v352_v42 }
 0x122   : > { %409 = vst.msk [vmem:[%s791_s24 + $0x48] sm:$0xff] %vm235_vm0, %v377_v43  ;;  %410 = vst.msk [vmem:[%s791_s24 + $0x50] sm:$0xff] %vm235_vm0, %v378_v45  ;;  %v392_v8 = vadd.f32 %v496_v46, %v353_v50  ;;  %v393_v10 = vadd.f32 %v496_v46, %v354_v54  ;;  %v394_v11 = vadd.f32 %v496_v46, %v355_v58 }
 0x123   : > { %411 = vst.msk [vmem:[%s791_s24 + $0x58] sm:$0xff] %vm235_vm0, %v379_v5  ;;  %412 = vst.msk [vmem:[%s791_s24 + $0x60] sm:$0xff] %vm235_vm0, %v380_v14  ;;  %v395_v15 = vadd.f32 %v496_v46, %v356_v62  ;;  %v396_v17 = vadd.f32 %v496_v46, %v357_v6  ;;  %v397_v19 = vadd.f32 %v496_v46, %v358_v13 }
 0x124   : > { %413 = vst.msk [vmem:[%s791_s24 + $0x68] sm:$0xff] %vm235_vm0, %v381_v47  ;;  %414 = vst.msk [vmem:[%s791_s24 + $0x70] sm:$0xff] %vm235_vm0, %v382_v48  ;;  %v398_v20 = vadd.f32 %v496_v46, %v359_v18  ;;  %v399_v22 = vadd.f32 %v496_v46, %v360_v23 }
 0x125   : > { %415 = vst.msk [vmem:[%s791_s24 + $0x78] sm:$0xff] %vm235_vm0, %v383_v51  ;;  %416 = vst.msk [vmem:[%s791_s24 + $0x80] sm:$0xff] %vm235_vm0, %v384_v52 }
 0x126   : > { %417 = vst.msk [vmem:[%s791_s24 + $0x88] sm:$0xff] %vm235_vm0, %v385_v53  ;;  %418 = vst.msk [vmem:[%s791_s24 + $0x90] sm:$0xff] %vm235_vm0, %v386_v56 }
 0x127   : > { %419 = vst.msk [vmem:[%s791_s24 + $0x98] sm:$0xff] %vm235_vm0, %v387_v57  ;;  %420 = vst.msk [vmem:[%s791_s24 + $0xa0] sm:$0xff] %vm235_vm0, %v388_v59 }
 0x128   : > { %421 = vst.msk [vmem:[%s791_s24 + $0xa8] sm:$0xff] %vm235_vm0, %v389_v61  ;;  %422 = vst.msk [vmem:[%s791_s24 + $0xb0] sm:$0xff] %vm235_vm0, %v390_v63 }
 0x129   : > { %423 = vst.msk [vmem:[%s791_s24 + $0xb8] sm:$0xff] %vm235_vm0, %v391_v4  ;;  %424 = vst.msk [vmem:[%s791_s24 + $0xc0] sm:$0xff] %vm235_vm0, %v392_v8 }
 0x12a   : > { %425 = vst.msk [vmem:[%s791_s24 + $0xc8] sm:$0xff] %vm235_vm0, %v393_v10  ;;  %426 = vst.msk [vmem:[%s791_s24 + $0xd0] sm:$0xff] %vm235_vm0, %v394_v11 }
 0x12b   : > { %427 = vst.msk [vmem:[%s791_s24 + $0xd8] sm:$0xff] %vm235_vm0, %v395_v15  ;;  %428 = vst.msk [vmem:[%s791_s24 + $0xe0] sm:$0xff] %vm235_vm0, %v396_v17 }
 0x12c   : > { %429 = vst.msk [vmem:[%s791_s24 + $0xe8] sm:$0xff] %vm235_vm0, %v397_v19  ;;  %430 = vst.msk [vmem:[%s791_s24 + $0xf0] sm:$0xff] %vm235_vm0, %v398_v20 }
 0x12d   : > { %431 = vst.msk [vmem:[%s791_s24 + $0xf8] sm:$0xff] %vm235_vm0, %v399_v22 }
 0x12e PF: > { %s13_s12 = sadd.s32 1, %s519_s12  }
 0x12f   : > { %p10_p4 = scmp.ge.s32.totalorder %s13_s12, 4  }
 0x131   :  { %12 = sbr.rel (!%p10_p4) target bundleno = 1 (0x1), region = 62 }

</bundles_post_ra>
